<compile_context>
chip_gen: v6e
topology: v6e:2x2x1
jax: 0.10.0
libtpu: 0.0.40
codegen_flags: <defaults>
</compile_context>

<pallas_src>
import functools
import math

import jax
import jax.numpy as jnp
from jax import lax
from jax.experimental import pallas as pl
from jax.experimental.pallas import tpu as pltpu


def _round_up(x, m):
    return ((x + m - 1) // m) * m


def _pad_rows(x, rows):
    m = x.shape[0]
    if m == rows:
        return x
    return jnp.concatenate([x, jnp.zeros((rows - m,) + x.shape[1:], x.dtype)], 0)


@functools.lru_cache(maxsize=1)
def _vmem_limit_bytes():
    """Generation-aware scoped-VMEM limit (3/4 of physical, capped)."""
    try:
        cap = int(pltpu.get_tpu_info().vmem_capacity_bytes)
    except Exception:
        cap = 64 * 1024 * 1024          # conservative fallback (v7x physical)
    return int(min((cap * 3) // 4, 100 * 1024 * 1024))


# --------------------------------------------------------------------------
# Kernel 1: fused Q/K/V projections (MXU, bf16 operands, f32 accumulation).
# Weights arrive already in bf16; q/k are written as bf16, v as f32.
# --------------------------------------------------------------------------
def _qkv_kernel(xq_ref, xk_ref, xv_ref,
                wq_ref, wk_ref, wv_ref,
                bq_ref, bk_ref, bv_ref,
                q_ref, k_ref, v_ref):
    def proj(x_ref, w_ref, b_ref):
        x = x_ref[...].astype(jnp.bfloat16)
        return jnp.dot(x, w_ref[...], preferred_element_type=jnp.float32) + b_ref[...]

    q_ref[...] = proj(xq_ref, wq_ref, bq_ref).astype(jnp.bfloat16)
    k_ref[...] = proj(xk_ref, wk_ref, bk_ref).astype(jnp.bfloat16)
    v_ref[...] = proj(xv_ref, wv_ref, bv_ref)


def qkv_projection(xq, xk, xv, params, *, block_rows=512):
    """xq: (Mq, D); xk/xv: (Mkv, D). Returns q (Mq,C) bf16, k (Mkv,C) bf16,
    v (Mkv,Cv) f32."""
    Mq, D = xq.shape
    Mkv = xk.shape[0]

    # Pre-cast weights to bf16 ONCE (outside the kernel); biases stay f32.
    wq = params["wq"].astype(jnp.bfloat16)
    wk = params["wk"].astype(jnp.bfloat16)
    wv = params["wv"].astype(jnp.bfloat16)
    C = wq.shape[1]
    Cv = wv.shape[1]

    # bf16 outputs -> keep the row tile a multiple of 16.
    block_rows = max(16, (block_rows // 16) * 16)
    m_max = max(Mq, Mkv)
    tm = min(block_rows, _round_up(m_max, 16))
    mp = _round_up(m_max, tm)
    n_tiles = mp // tm

    # TODO(synk): when Mq != Mkv, pad the two streams separately instead of
    # padding both to max(Mq, Mkv).
    xq_p = _pad_rows(xq, mp)
    xk_p = _pad_rows(xk, mp)
    xv_p = _pad_rows(xv, mp)

    q, k, v = pl.pallas_call(
        _qkv_kernel,
        out_shape=(
            jax.ShapeDtypeStruct((mp, C), jnp.bfloat16),
            jax.ShapeDtypeStruct((mp, C), jnp.bfloat16),
            jax.ShapeDtypeStruct((mp, Cv), jnp.float32),
        ),
        grid=(n_tiles,),
        in_specs=[
            pl.BlockSpec((tm, D), lambda i: (i, 0)),
            pl.BlockSpec((tm, D), lambda i: (i, 0)),
            pl.BlockSpec((tm, D), lambda i: (i, 0)),
            # Resident weights / biases (constant index map).
            pl.BlockSpec((D, C), lambda i: (0, 0)),
            pl.BlockSpec((D, C), lambda i: (0, 0)),
            pl.BlockSpec((D, Cv), lambda i: (0, 0)),
            pl.BlockSpec((1, C), lambda i: (0, 0)),
            pl.BlockSpec((1, C), lambda i: (0, 0)),
            pl.BlockSpec((1, Cv), lambda i: (0, 0)),
        ],
        out_specs=(
            pl.BlockSpec((tm, C), lambda i: (i, 0)),
            pl.BlockSpec((tm, C), lambda i: (i, 0)),
            pl.BlockSpec((tm, Cv), lambda i: (i, 0)),
        ),
        compiler_params=pltpu.CompilerParams(
            dimension_semantics=("parallel",),
            vmem_limit_bytes=_vmem_limit_bytes()),
    )(xq_p, xk_p, xv_p, wq, wk, wv, params["bq"], params["bk"], params["bv"])
    return q[:Mq], k[:Mkv], v[:Mkv]


# --------------------------------------------------------------------------
# Kernel 2: period-based dependency scores, fused per batch (no HBM E, no
# one-hot circulant matrix).
#   W[b, s, m]  = sum_c k[b,s,c] * q[b, m % L, c]        (MXU, bf16 operands)
#   corr[b,tau] = (1/C) * sum_s W[b, s, s + tau]
#               = (1/C) * sum_t q[b,t,:].k[b,(t-tau)%L,:]   (== torch corr)
# The diagonal reduction uses static in-register slices of W (the periodic
# extension qd=[q;q] makes every diagonal a contiguous slice).
# --------------------------------------------------------------------------
def _corr_kernel(k_ref, qd_ref, o_ref, *, inv_c):
    L = k_ref.shape[1]
    kb = k_ref[0]                      # (L, C)  bf16
    qdb = qd_ref[0]                    # (2L, C) bf16
    w = lax.dot_general(kb, qdb, (((1,), (1,)), ((), ())),
                        preferred_element_type=jnp.float32)   # (L, 2L) f32
    acc = w[0:1, 0:L]
    # TODO(synk): for long L replace this static unrolled reduction (and the
    # HBM-doubled qd input) with a strided pltpu.roll + sublane sum on the XLU.
    for s in range(1, L):
        acc = acc + w[s:s + 1, s:s + L]
    o_ref[0] = acc * inv_c


def correlation_scores(k, qd):
    """k: (B, L, C) bf16; qd: (B, 2L, C) bf16 (periodic extension of q)."""
    B, L, C = k.shape
    out = pl.pallas_call(
        functools.partial(_corr_kernel, inv_c=1.0 / C),
        out_shape=jax.ShapeDtypeStruct((B, 1, L), jnp.float32),
        grid=(B,),
        in_specs=[
            pl.BlockSpec((1, L, C), lambda b: (b, 0, 0)),
            pl.BlockSpec((1, 2 * L, C), lambda b: (b, 0, 0)),
        ],
        out_specs=pl.BlockSpec((1, 1, L), lambda b: (b, 0, 0)),
        compiler_params=pltpu.CompilerParams(
            dimension_semantics=("parallel",),
            vmem_limit_bytes=_vmem_limit_bytes()),
    )(k, qd)
    return out[:, 0, :]


# --------------------------------------------------------------------------
# Kernel 3: time-delay aggregation fused with the output projection.
#   agg[b,t,c] = sum_i w[b,i] * v[b, (t + delay[b,i]) % L, c]
#   out[b]     = agg[b] @ Wo + bo
# Several batches per grid step: per-batch circular gathers feed a bf16 VMEM
# scratch of (Bt*L, Cv) rows, then ONE wide MXU matmul against resident Wo.
# delays / softmax weights arrive via scalar prefetch (SMEM).
# --------------------------------------------------------------------------
def _agg_out_kernel(delay_ref, weight_ref, v_ref, wo_ref, bo_ref, o_ref,
                    v2_scr, agg_scr, *, bt):
    pid = pl.program_id(0)
    L, Cv = v_ref.shape[1], v_ref.shape[2]
    top_k = delay_ref.shape[1]

    for bi in range(bt):                       # bt is small and static
        b = pid * bt + bi
        vb = v_ref[bi]                         # (L, Cv) f32
        v2_scr[pl.ds(0, L), :] = vb            # doubled copy -> every circular
        v2_scr[pl.ds(L, L), :] = vb            # shift is one contiguous slice

        acc = jnp.zeros((L, Cv), jnp.float32)
        for i in range(top_k):                 # top_k is tiny and static
            d = delay_ref[b, i]
            w = weight_ref[b, i]
            acc = acc + w * v2_scr[pl.ds(d, L), :]   # v[(t + d) % L]
        agg_scr[pl.ds(bi * L, L), :] = acc.astype(jnp.bfloat16)

    out = jnp.dot(agg_scr[...], wo_ref[...],
                  preferred_element_type=jnp.float32) + bo_ref[...]
    for bi in range(bt):
        o_ref[bi] = out[bi * L:(bi + 1) * L, :]


def aggregate_and_project(delay, weights, v, wo, bo, *, agg_batch=8):
    B, L, Cv = v.shape
    D = wo.shape[1]
    wo = wo.astype(jnp.bfloat16)               # pre-cast once, resident in VMEM

    bt = 1
    for cand in (agg_batch, 8, 4, 2, 1):
        if cand and cand <= B and B % cand == 0:
            bt = cand
            break

    return pl.pallas_call(
        functools.partial(_agg_out_kernel, bt=bt),
        out_shape=jax.ShapeDtypeStruct((B, L, D), jnp.float32),
        grid_spec=pltpu.PrefetchScalarGridSpec(
            num_scalar_prefetch=2,
            grid=(B // bt,),
            in_specs=[
                pl.BlockSpec((bt, L, Cv), lambda g, d, w: (g, 0, 0)),
                pl.BlockSpec((Cv, D), lambda g, d, w: (0, 0)),
                pl.BlockSpec((1, D), lambda g, d, w: (0, 0)),
            ],
            out_specs=pl.BlockSpec((bt, L, D), lambda g, d, w: (g, 0, 0)),
            scratch_shapes=[pltpu.VMEM((2 * L, Cv), jnp.float32),
                            pltpu.VMEM((bt * L, Cv), jnp.bfloat16)],
        ),
        compiler_params=pltpu.CompilerParams(
            dimension_semantics=("parallel",),
            vmem_limit_bytes=_vmem_limit_bytes()),
    )(delay, weights, v, wo, bo)


# --------------------------------------------------------------------------
# Full AutoCorrelationLayer forward
# --------------------------------------------------------------------------
def autocorrelation_layer(queries, keys, values, params, n_heads, factor=1,
                          *, block_rows=512, agg_batch=8):
    B, L, D = queries.shape
    _, S, _ = keys.shape

    # torch truncates projected k/v to length L when S > L; truncating the raw
    # inputs first is identical (per-position linear) and cheaper.
    if S > L:
        keys = keys[:, :L]
        values = values[:, :L]
        S = L

    # Fused Q / K / V projections (single Pallas call).  q/k come back bf16.
    q2, k2, v2 = qkv_projection(
        queries.reshape(B * L, D),
        keys.reshape(B * S, D),
        values.reshape(B * S, D),
        params, block_rows=block_rows)
    C = q2.shape[-1]       # n_heads * d_keys
    Cv = v2.shape[-1]      # n_heads * d_values
    q = q2.reshape(B, L, C)
    k = k2.reshape(B, S, C)
    v = v2.reshape(B, S, Cv)

    if L > S:
        # torch zero-pads the *projected* k/v (bias not applied to the pad).
        k = jnp.concatenate([k, jnp.zeros((B, L - S, C), k.dtype)], axis=1)
        v = jnp.concatenate([v, jnp.zeros((B, L - S, Cv), v.dtype)], axis=1)

    # Periodic extension of q (bf16, plain JAX concat) so every circular
    # diagonal of k @ qd^T is a contiguous slice inside the fused corr kernel.
    qd = jnp.concatenate([q, q], axis=1)                   # (B, 2L, C)
    mean_value = correlation_scores(k, qd)                 # (B, L) f32

    # top-k delays + softmax weights (tiny, data dependent -> plain JAX glue).
    # TODO(synk): top-k selection / softmax stay outside Pallas.
    top_k = max(1, int(factor * math.log(L)))
    weights, delay = lax.top_k(mean_value, top_k)
    tmp_corr = jax.nn.softmax(weights, axis=-1).astype(jnp.float32)
    delay = delay.astype(jnp.int32)

    # Time-delay aggregation + output projection (fused Pallas kernel).
    out = aggregate_and_project(delay, tmp_corr, v, params["wo"], params["bo"],
                                agg_batch=agg_batch)
    return out, None   # output_attention=False -> attn is None


# --------------------------------------------------------------------------
# Deterministic parameter init (nn.Linear shapes; uniform +-1/sqrt(fan_in))
# --------------------------------------------------------------------------
def init_params(key, d_model, n_heads, d_keys=None, d_values=None):
    d_keys = d_keys or d_model // n_heads
    d_values = d_values or d_model // n_heads
    ks = jax.random.split(key, 8)

    def lin(kw, kb, fan_in, fan_out):
        bound = 1.0 / math.sqrt(fan_in)
        w = jax.random.uniform(kw, (fan_in, fan_out), jnp.float32, -bound, bound)
        b = jax.random.uniform(kb, (1, fan_out), jnp.float32, -bound, bound)
        return w, b

    wq, bq = lin(ks[0], ks[1], d_model, d_keys * n_heads)
    wk, bk = lin(ks[2], ks[3], d_model, d_keys * n_heads)
    wv, bv = lin(ks[4], ks[5], d_model, d_values * n_heads)
    wo, bo = lin(ks[6], ks[7], d_values * n_heads, d_model)
    return dict(wq=wq, bq=bq, wk=wk, bk=bk, wv=wv, bv=bv, wo=wo, bo=bo)


# --------------------------------------------------------------------------
# Pure-JAX reference (no Pallas).  Same math as the torch module; matmul
# operands are rounded to bf16 to match the kernels' MXU operand precision so
# the data-dependent top-k selection is numerically stable between the two.
# Correlation scores are accumulated in f32 (like the kernel).
# --------------------------------------------------------------------------
def _reference(queries, keys, values, params, n_heads, factor=1):
    B, L, D = queries.shape
    S = keys.shape[1]
    bf16 = jnp.bfloat16

    def lin(x, w, b):
        return jnp.einsum('...i,io->...o', x.astype(bf16), w.astype(bf16),
                          preferred_element_type=jnp.float32) + b[0]

    if S > L:
        keys = keys[:, :L]
        values = values[:, :L]
        S = L
    q = lin(queries, params["wq"], params["bq"])
    k = lin(keys, params["wk"], params["bk"])
    v = lin(values, params["wv"], params["bv"])
    if L > S:
        k = jnp.concatenate([k, jnp.zeros((B, L - S, k.shape[-1]), k.dtype)], 1)
        v = jnp.concatenate([v, jnp.zeros((B, L - S, v.shape[-1]), v.dtype)], 1)
    C = q.shape[-1]

    # corr[b, tau] = (1/C) * sum_t sum_c q[b,t,c] * k[b,(t-tau)%L,c]
    E = jnp.einsum('btc,bsc->bts', q.astype(bf16), k.astype(bf16),
                   preferred_element_type=jnp.float32)
    t_idx = jnp.arange(L)[:, None]
    s_idx = jnp.mod(t_idx - jnp.arange(L)[None, :], L)
    corr = E[:, t_idx, s_idx].sum(axis=1) / C

    top_k = max(1, int(factor * math.log(L)))
    w, d = lax.top_k(corr, top_k)
    tc = jax.nn.softmax(w, axis=-1)
    v2 = jnp.concatenate([v, v], axis=1)
    agg = jnp.zeros_like(v)
    for i in range(top_k):
        pat = jnp.stack(
            [lax.dynamic_slice_in_dim(v2[b], d[b, i], L, axis=0)
             for b in range(B)], 0)
        agg = agg + tc[:, i][:, None, None] * pat
    return jnp.einsum('blc,cd->bld', agg.astype(bf16),
                      params["wo"].astype(bf16),
                      preferred_element_type=jnp.float32) + params["bo"][0]


if __name__ == "__main__":
    key = jax.random.PRNGKey(0)
    B, L, S, D, H = 2, 32, 32, 64, 4
    kq, kk, kv, kp = jax.random.split(key, 4)
    queries = jax.random.normal(kq, (B, L, D), jnp.float32)
    keys = jax.random.normal(kk, (B, S, D), jnp.float32)
    values = jax.random.normal(kv, (B, S, D), jnp.float32)
    params = init_params(kp, D, H)

    # block_rows=32 so the fused QKV projection exercises a multi-step,
    # software-pipelined grid (B*L = 64 rows -> 2 row tiles) even at demo size.
    out, attn = autocorrelation_layer(queries, keys, values, params, H,
                                      block_rows=32)
    out = jax.block_until_ready(out)

    assert out.shape == (B, L, D)
    ref = _reference(queries, keys, values, params, H)
    err = float(jnp.max(jnp.abs(out - ref)))
    assert jnp.allclose(out, ref, rtol=1e-2, atol=1e-2), err
    print("KERNEL_OK")
</pallas_src>

<mosaic_0001>
module attributes {stable_mosaic.version = 11 : i64} {
  func.func @_qkv_kernel(%arg0: i32, %arg1: memref<32x64xf32, #tpu.memory_space<vmem>>, %arg2: memref<32x64xf32, #tpu.memory_space<vmem>>, %arg3: memref<32x64xf32, #tpu.memory_space<vmem>>, %arg4: memref<64x64xbf16, #tpu.memory_space<vmem>>, %arg5: memref<64x64xbf16, #tpu.memory_space<vmem>>, %arg6: memref<64x64xbf16, #tpu.memory_space<vmem>>, %arg7: memref<1x64xf32, #tpu.memory_space<vmem>>, %arg8: memref<1x64xf32, #tpu.memory_space<vmem>>, %arg9: memref<1x64xf32, #tpu.memory_space<vmem>>, %arg10: memref<32x64xbf16, #tpu.memory_space<vmem>>, %arg11: memref<32x64xbf16, #tpu.memory_space<vmem>>, %arg12: memref<32x64xf32, #tpu.memory_space<vmem>>) attributes {dimension_semantics = [#tpu.dimension_semantics<parallel>], iteration_bounds = array<i64: 2>, scalar_prefetch = 0 : i64, scratch_operands = 0 : i64, tpu.core_type = #tpu.core_type<tc>, window_params = [{transform_indices = @transform_0, window_bounds = array<i64: 32, 64>}, {transform_indices = @transform_1, window_bounds = array<i64: 32, 64>}, {transform_indices = @transform_2, window_bounds = array<i64: 32, 64>}, {pipeline_mode = #tpu.pipeline_mode<synchronous>, transform_indices = @transform_3, window_bounds = array<i64: 64, 64>}, {pipeline_mode = #tpu.pipeline_mode<synchronous>, transform_indices = @transform_4, window_bounds = array<i64: 64, 64>}, {pipeline_mode = #tpu.pipeline_mode<synchronous>, transform_indices = @transform_5, window_bounds = array<i64: 64, 64>}, {pipeline_mode = #tpu.pipeline_mode<synchronous>, transform_indices = @transform_6, window_bounds = array<i64: 1, 64>}, {pipeline_mode = #tpu.pipeline_mode<synchronous>, transform_indices = @transform_7, window_bounds = array<i64: 1, 64>}, {pipeline_mode = #tpu.pipeline_mode<synchronous>, transform_indices = @transform_8, window_bounds = array<i64: 1, 64>}, {transform_indices = @transform_9, window_bounds = array<i64: 32, 64>}, {transform_indices = @transform_10, window_bounds = array<i64: 32, 64>}, {transform_indices = @transform_11, window_bounds = array<i64: 32, 64>}]} {
    %c0 = arith.constant 0 : index
    %c0_0 = arith.constant 0 : index
    %0 = vector.load %arg1[%c0, %c0_0] : memref<32x64xf32, #tpu.memory_space<vmem>>, vector<32x64xf32>
    %1 = arith.truncf %0 : vector<32x64xf32> to vector<32x64xbf16>
    %c0_1 = arith.constant 0 : index
    %c0_2 = arith.constant 0 : index
    %2 = vector.load %arg4[%c0_1, %c0_2] : memref<64x64xbf16, #tpu.memory_space<vmem>>, vector<64x64xbf16>
    %cst = arith.constant dense<0.000000e+00> : vector<32x64xf32>
    %3 = tpu.matmul %1, %2, %cst {dimension_numbers = #tpu.dot_dimension_numbers<[1], [0], [0], [1], [0, 0, 1, 1], [], []>} : vector<32x64xbf16>, vector<64x64xbf16>, vector<32x64xf32> -> vector<32x64xf32>
    %c0_3 = arith.constant 0 : index
    %c0_4 = arith.constant 0 : index
    %4 = vector.load %arg7[%c0_3, %c0_4] : memref<1x64xf32, #tpu.memory_space<vmem>>, vector<1x64xf32>
    %5 = vector.broadcast %4 : vector<1x64xf32> to vector<32x64xf32>
    %6 = arith.addf %3, %5 : vector<32x64xf32>
    %7 = arith.truncf %6 : vector<32x64xf32> to vector<32x64xbf16>
    %c0_5 = arith.constant 0 : index
    %c0_6 = arith.constant 0 : index
    %8 = vector.load %arg10[%c0_5, %c0_6] : memref<32x64xbf16, #tpu.memory_space<vmem>>, vector<32x64xbf16>
    tpu.vector_store %arg10[%c0_5, %c0_6], %7 {strides = array<i32>} : memref<32x64xbf16, #tpu.memory_space<vmem>>, vector<32x64xbf16>,
    %c0_7 = arith.constant 0 : index
    %c0_8 = arith.constant 0 : index
    %9 = vector.load %arg2[%c0_7, %c0_8] : memref<32x64xf32, #tpu.memory_space<vmem>>, vector<32x64xf32>
    %10 = arith.truncf %9 : vector<32x64xf32> to vector<32x64xbf16>
    %c0_9 = arith.constant 0 : index
    %c0_10 = arith.constant 0 : index
    %11 = vector.load %arg5[%c0_9, %c0_10] : memref<64x64xbf16, #tpu.memory_space<vmem>>, vector<64x64xbf16>
    %cst_11 = arith.constant dense<0.000000e+00> : vector<32x64xf32>
    %12 = tpu.matmul %10, %11, %cst_11 {dimension_numbers = #tpu.dot_dimension_numbers<[1], [0], [0], [1], [0, 0, 1, 1], [], []>} : vector<32x64xbf16>, vector<64x64xbf16>, vector<32x64xf32> -> vector<32x64xf32>
    %c0_12 = arith.constant 0 : index
    %c0_13 = arith.constant 0 : index
    %13 = vector.load %arg8[%c0_12, %c0_13] : memref<1x64xf32, #tpu.memory_space<vmem>>, vector<1x64xf32>
    %14 = vector.broadcast %13 : vector<1x64xf32> to vector<32x64xf32>
    %15 = arith.addf %12, %14 : vector<32x64xf32>
    %16 = arith.truncf %15 : vector<32x64xf32> to vector<32x64xbf16>
    %c0_14 = arith.constant 0 : index
    %c0_15 = arith.constant 0 : index
    %17 = vector.load %arg11[%c0_14, %c0_15] : memref<32x64xbf16, #tpu.memory_space<vmem>>, vector<32x64xbf16>
    tpu.vector_store %arg11[%c0_14, %c0_15], %16 {strides = array<i32>} : memref<32x64xbf16, #tpu.memory_space<vmem>>, vector<32x64xbf16>,
    %c0_16 = arith.constant 0 : index
    %c0_17 = arith.constant 0 : index
    %18 = vector.load %arg3[%c0_16, %c0_17] : memref<32x64xf32, #tpu.memory_space<vmem>>, vector<32x64xf32>
    %19 = arith.truncf %18 : vector<32x64xf32> to vector<32x64xbf16>
    %c0_18 = arith.constant 0 : index
    %c0_19 = arith.constant 0 : index
    %20 = vector.load %arg6[%c0_18, %c0_19] : memref<64x64xbf16, #tpu.memory_space<vmem>>, vector<64x64xbf16>
    %cst_20 = arith.constant dense<0.000000e+00> : vector<32x64xf32>
    %21 = tpu.matmul %19, %20, %cst_20 {dimension_numbers = #tpu.dot_dimension_numbers<[1], [0], [0], [1], [0, 0, 1, 1], [], []>} : vector<32x64xbf16>, vector<64x64xbf16>, vector<32x64xf32> -> vector<32x64xf32>
    %c0_21 = arith.constant 0 : index
    %c0_22 = arith.constant 0 : index
    %22 = vector.load %arg9[%c0_21, %c0_22] : memref<1x64xf32, #tpu.memory_space<vmem>>, vector<1x64xf32>
    %23 = vector.broadcast %22 : vector<1x64xf32> to vector<32x64xf32>
    %24 = arith.addf %21, %23 : vector<32x64xf32>
    %c0_23 = arith.constant 0 : index
    %c0_24 = arith.constant 0 : index
    %25 = vector.load %arg12[%c0_23, %c0_24] : memref<32x64xf32, #tpu.memory_space<vmem>>, vector<32x64xf32>
    tpu.vector_store %arg12[%c0_23, %c0_24], %24 {strides = array<i32>} : memref<32x64xf32, #tpu.memory_space<vmem>>, vector<32x64xf32>,
    return
  }
  func.func @transform_0(%arg0: i32) -> (i32, i32) {
    %c0_i32 = arith.constant 0 : i32
    %c0_i32_0 = arith.constant 0 : i32
    return %arg0, %c0_i32 : i32, i32
  }
  func.func @transform_1(%arg0: i32) -> (i32, i32) {
    %c0_i32 = arith.constant 0 : i32
    %c0_i32_0 = arith.constant 0 : i32
    return %arg0, %c0_i32 : i32, i32
  }
  func.func @transform_2(%arg0: i32) -> (i32, i32) {
    %c0_i32 = arith.constant 0 : i32
    %c0_i32_0 = arith.constant 0 : i32
    return %arg0, %c0_i32 : i32, i32
  }
  func.func @transform_3(%arg0: i32) -> (i32, i32) {
    %c0_i32 = arith.constant 0 : i32
    %c0_i32_0 = arith.constant 0 : i32
    %c0_i32_1 = arith.constant 0 : i32
    return %c0_i32, %c0_i32_0 : i32, i32
  }
  func.func @transform_4(%arg0: i32) -> (i32, i32) {
    %c0_i32 = arith.constant 0 : i32
    %c0_i32_0 = arith.constant 0 : i32
    %c0_i32_1 = arith.constant 0 : i32
    return %c0_i32, %c0_i32_0 : i32, i32
  }
  func.func @transform_5(%arg0: i32) -> (i32, i32) {
    %c0_i32 = arith.constant 0 : i32
    %c0_i32_0 = arith.constant 0 : i32
    %c0_i32_1 = arith.constant 0 : i32
    return %c0_i32, %c0_i32_0 : i32, i32
  }
  func.func @transform_6(%arg0: i32) -> (i32, i32) {
    %c0_i32 = arith.constant 0 : i32
    %c0_i32_0 = arith.constant 0 : i32
    %c0_i32_1 = arith.constant 0 : i32
    return %c0_i32, %c0_i32_0 : i32, i32
  }
  func.func @transform_7(%arg0: i32) -> (i32, i32) {
    %c0_i32 = arith.constant 0 : i32
    %c0_i32_0 = arith.constant 0 : i32
    %c0_i32_1 = arith.constant 0 : i32
    return %c0_i32, %c0_i32_0 : i32, i32
  }
  func.func @transform_8(%arg0: i32) -> (i32, i32) {
    %c0_i32 = arith.constant 0 : i32
    %c0_i32_0 = arith.constant 0 : i32
    %c0_i32_1 = arith.constant 0 : i32
    return %c0_i32, %c0_i32_0 : i32, i32
  }
  func.func @transform_9(%arg0: i32) -> (i32, i32) {
    %c0_i32 = arith.constant 0 : i32
    %c0_i32_0 = arith.constant 0 : i32
    return %arg0, %c0_i32 : i32, i32
  }
  func.func @transform_10(%arg0: i32) -> (i32, i32) {
    %c0_i32 = arith.constant 0 : i32
    %c0_i32_0 = arith.constant 0 : i32
    return %arg0, %c0_i32 : i32, i32
  }
  func.func @transform_11(%arg0: i32) -> (i32, i32) {
    %c0_i32 = arith.constant 0 : i32
    %c0_i32_0 = arith.constant 0 : i32
    return %arg0, %c0_i32 : i32, i32
  }
}

</mosaic_0001>

<bundles_post_ra>
// kernel: tpu_custom_call.1
= control target key start
LH: loop header
LB: loop body
LE: loop exit
PB: predicated region body
PF: predicated region fallthrough
CT: control target
= control target key end

     0   :  { %s2215_s0 = inlined_call_operand.hbm [shape: f32[64,64], index: 0, kind: input, shape index: {}]   ;;  %s2216_s1 = inlined_call_operand.hbm [shape: f32[64,64], index: 1, kind: input, shape index: {}]   ;;  %s2217_s2 = inlined_call_operand.hbm [shape: f32[64,64], index: 2, kind: input, shape index: {}]   ;;  %s2218_s3 = inlined_call_operand.hbm [shape: bf16[64,64], index: 3, kind: input, shape index: {}]   ;;  %s2219_s4 = inlined_call_operand.hbm [shape: bf16[64,64], index: 4, kind: input, shape index: {}]   ;;  %s2220_s5 = inlined_call_operand.hbm [shape: bf16[64,64], index: 5, kind: input, shape index: {}]   ;;  %s2221_s6 = inlined_call_operand.vmem [shape: f32[1,64], index: 6, kind: input, shape index: {}]   ;;  %s2222_s7 = inlined_call_operand.vmem [shape: f32[1,64], index: 7, kind: input, shape index: {}]   ;;  %s2223_s8 = inlined_call_operand.vmem [shape: f32[1,64], index: 8, kind: input, shape index: {}]   ;;  %s2224_s9 = inlined_call_operand.hbm [shape: bf16[64,64], index: 9, kind: output, shape index: {0}]   ;;  %s2225_s10 = inlined_call_operand.hbm [shape: bf16[64,64], index: 10, kind: output, shape index: {1}]   ;;  %s2226_s11 = inlined_call_operand.hbm [shape: f32[64,64], index: 11, kind: output, shape index: {2}]  }
   0x1   :  { %2251 = sst [smem:[#allocation28_spill]] %s2216_s1 }
   0x2   :  { %2252 = sst [smem:[#allocation29_spill]] %s2218_s3 }
   0x3   :  { %2253 = sst [smem:[#allocation30_spill]] %s2219_s4 }
   0x4   :  { %2254 = sst [smem:[#allocation31_spill]] %s2223_s8 }
   0x5   :  { %2255 = sst [smem:[#allocation32_spill]] %s2226_s11 }
   0x6   :  { %17 = vsyncpa [#allocation3], 0 }
   0x7   :  { %19 = vsyncpa [#allocation3 + $0x1], 0 }
   0x8   :  { %20 = vsyncpa [#allocation6], 0 }
   0x9   :  { %22 = vsyncpa [#allocation6 + $0x1], 0 }
   0xa   :  { %23 = vsyncpa [#allocation9], 0 }
   0xb   :  { %24 = vsyncpa [#allocation12], 0 }
   0xc   :  { %25 = vsyncpa [#allocation4], 0 }
   0xd   :  { %27 = vsyncpa [#allocation4 + $0x1], 0 }
   0xe   :  { %28 = vsyncpa [#allocation15], 0 }
   0xf   :  { %30 = vsyncpa [#allocation15 + $0x1], 0  ;;  %s1782_s17 = smov 0   ;;  %s1784_s18 = smov 0  }
  0x10   :  { %s1786_s19 = smov 0   ;;  %s1788_s20 = smov 0  }
  0x11 LB: > { %2256 = sst [smem:[#allocation23_spill]] %s1691_s17  ;;  %s1803_s21 = sadd.s32 4294967295, %s1703_s20   ;;  %s1703_s20 = sphi %s1788_s20, %s2295_s20   ;;  %s1699_s19 = sphi %s1786_s19, %s2299_s19   ;;  %s1695_s18 = sphi %s1784_s18, %s2298_s18   ;;  %s1691_s17 = sphi %s1782_s17, %s2297_s17  }
  0x12   : > { %2257 = sst [smem:[#allocation24_spill]] %s1703_s20  ;;  %s2229_s22 = sadd.s32 4294967294, %s1703_s20  }
  0x13   : > { %s1807_s23 = sadd.s32 1, %s1703_s20   ;;  %s43_s24 = sadd.s32 1, %s1699_s19 }
  0x14   : > { %2258 = sst [smem:[#allocation25_spill]] %s1807_s23  ;;  %s40_s25 = ssub.s32 %s1703_s20, %s1807_s23 }
  0x15   : > { %p50_p0 = scmp.ne.s32.totalorder %s1699_s19, %s1695_s18  ;;  %p41_p1 = scmp.eq.s32.totalorder %s40_s25, 0 }
  0x16   : > { %p51_p2 = scmp.eq.s32.totalorder %s1703_s20, 0  ;;  %p56_p3 = scmp.ne.s32.totalorder %s1695_s18, %s1691_s17 }
  0x17   : > { %p2227_p4 = scmp.eq.s32.totalorder %s1803_s21, 0  ;;  %p258_p7 = scmp.eq.s32.totalorder %s1803_s21, 1 }
  0x18   : > { %s1819_s26 = scalar_select %p41_p1, %s1699_s19, %s43_s24  }
  0x19   : > { %p1821_p5 = por %p51_p2, %p50_p0  ;;  %p1827_p6 = por %p2227_p4, %p56_p3 }
  0x1a   : > { %2259 = sst [smem:[#allocation26_spill]] %s1819_s26  ;;  %p264_p8 = scmp.eq.s32.totalorder %s2229_s22, 1 }
  0x1b   : > { %s2261_s28 = scalar_select %p1827_p6, 1, 0 }
  0x1c   : > { %p1160_p9 = scmp.ge.s32.totalorder %s1703_s20, 1  ;;  %p323_p10 = scmp.lt.s32.totalorder %s1703_s20, 3 }
  0x1d   : > { %p1836_p11 = por %p258_p7, %p50_p0  ;;  %p1840_p12 = por %p264_p8, %p56_p3 }
  0x1e   : > { %p1844_p13 = pnand %p1160_p9, %p323_p10  ;;  %s1705_s13 = smov [#allocation8]  }
  0x1f   : > { %s2262_s29 = scalar_select %p1836_p11, 1, 0 }
  0x20   : > { %s2263_s30 = scalar_select %p1840_p12, 1, 0 }
  0x21   : > { %s2265_s12 = scalar_select %p1844_p13, 1, 0 }
  0x22   : > { %2264 = sst [smem:[#allocation27_spill]] %s2263_s30  ;;  %p1316_p1 = pneg %p1844_p13 }
  0x23   : > { %s335_s14 = sshll.u32 %s1705_s13, 4  ;;  %p1349_p3 = scmp.lt.s32.totalorder %s1703_s20, 2  ;;  %s336_s14 = int_to_ptr.vmem [resolvable:$true] %s335_s14 }
  0x24   : > { %p1852_p2 = pnand %p1316_p1, %p2227_p4  ;;  %s2230_s16 = sand.u32 1, %s1699_s19  }
  0x25   : > { %s1861_s24 = sshll.u32 %s2230_s16, 5  ;;  %s1420_s25 = scalar_lea.vmem %s336_s14, 512 }
  0x26   : > { %s2266_s15 = scalar_select %p1852_p2, 1, 0 }
  0x27   : > { %p2242_p7 = pneg %p1852_p2  ;;  %p1421_p8 = scmp.ne.s32.totalorder %s336_s14, %s1420_s25 }
  0x28   : > { %p1428_p1 = scmp.lt.s32.totalorder %s336_s14, %s336_s14  ;;  %p1429_p4 = scmp.lt.s32.totalorder %s1420_s25, %s1420_s25 }
  0x29   : > { %p1423_p9 = pnand %p1421_p8, %p2242_p7 }
  0x2a   : > { %p1430_p12 = por %p1429_p4, %p1428_p1 }
  0x2b   : > { %p1424_p10 = pneg %p1423_p9 }
  0x2d   : > { %p1431_p11 = pnand %p1430_p12, %p1424_p10 }
  0x2f   : > { %1434 = shalt.err (!%p1431_p11)
}
  0x30   : > { %s2236_s13 = smov 64   ;;  %s2238_s22 = smov 4  }
  0x31   : > { %s2267_s3 = sld [smem:[#allocation29_spill]]  ;;  %s1877_s25 = sshll.u32 %s1703_s20, 9 }
  0x32   : > { %p1883_p4 = pnand %p1349_p3, %p1821_p5  ;;  %s405_s30 = sand.u32 1, %s1703_s20  }
  0x33   : > { %s2269_s1 = sld [smem:[#allocation28_spill]]  ;;  %s409_s26 = scalar_lea.vmem [#allocation5], %s1861_s24 }
  0x34   : > { %s1897_s27 = scalar_lea.sflag [#allocation6], %s405_s30  ;;  %p1903_p11 = pneg %p1883_p4 }
  0x37   : > { %1319 = dma.hbm_to_vmem [thread:$0]  (!%p1852_p2), %s2267_s3, 512, %s336_s14, [#allocation9], %s2236_s13, %s2236_s13, %s2238_s22  }
  0x38   : > { %s416_s14 = sshll.u32 %s409_s26, 4  ;;  %s1895_s14 = int_to_ptr.vmem [resolvable:$true] %s416_s14 }
  0x39   : > { %s1892_s8 = scalar_lea.hbm %s2269_s1, %s1877_s25  ;;  %s1440_s22 = scalar_lea.hbm %s2269_s1, 1024 }
  0x3a   : > { %s1435_s16 = scalar_lea.hbm %s1892_s8, 512  ;;  %p1441_p8 = scmp.lt.s32.totalorder %s1892_s8, %s2269_s1 }
  0x3b   : > { %p1436_p5 = scmp.ne.s32.totalorder %s1892_s8, %s1435_s16  ;;  %p1442_p9 = scmp.lt.s32.totalorder %s1440_s22, %s1435_s16 }
  0x3d   : > { %p1438_p12 = pnand %p1903_p11, %p1436_p5  ;;  %p1443_p10 = por %p1442_p9, %p1441_p8 }
  0x3f   : > { %p1439_p3 = pneg %p1438_p12 }
  0x41   : > { %p1444_p1 = pnand %p1443_p10, %p1439_p3 }
  0x43   : > { %1447 = shalt.err (!%p1444_p1)
}
  0x44   : > { %s1448_s30 = scalar_lea.vmem %s1895_s14, 512  ;;  %s1708_s20 = smov [#allocation5]  }
  0x45   : > { %p1449_p0 = scmp.ne.s32.totalorder %s1895_s14, %s1448_s30  ;;  %s1453_s11 = sshll.u32 %s1708_s20, 4  ;;  %s1454_s11 = int_to_ptr.vmem [resolvable:$false] %s1453_s11 }
  0x46   : > { %s1455_s17 = scalar_lea.vmem %s1454_s11, 1024  ;;  %p1456_p7 = scmp.lt.s32.totalorder %s1895_s14, %s1454_s11 }
  0x47   : > { %p1451_p5 = pnand %p1449_p0, %p1903_p11  ;;  %p1457_p6 = scmp.lt.s32.totalorder %s1455_s17, %s1448_s30 }
  0x49   : > { %p1452_p12 = pneg %p1451_p5  ;;  %p1458_p13 = por %p1457_p6, %p1456_p7 }
  0x4b   : > { %p1459_p2 = pnand %p1458_p13, %p1452_p12 }
  0x4d   : > { %1462 = shalt.err (!%p1459_p2)
}
  0x4e   : > { %s2247_s3 = smov 128   ;;  %s2249_s22 = smov 8  }
  0x4f   : > { %1332 = dma.hbm_to_vmem [thread:$0]  (!%p1883_p4), %s1892_s8, 512, %s1895_s14, %s1897_s27, %s2247_s3, %s2247_s3, %s2249_s22  }
  0x50   : > { %s1711_s20 = smov [#allocation10]   ;;  %s1712_s26 = smov [#allocation11]  }
  0x51   : > { %s348_s16 = sshll.u32 %s1711_s20, 4  ;;  %s361_s30 = sshll.u32 %s1712_s26, 4  ;;  %s349_s16 = int_to_ptr.vmem [resolvable:$true] %s348_s16  ;;  %s362_s30 = int_to_ptr.vmem [resolvable:$true] %s361_s30 }
  0x52   : > { %s1474_s11 = scalar_lea.vmem %s349_s16, 512  ;;  %p2271_p13 = scmp.ne.s32.totalorder %s2266_s15, 0 }
  0x53   : > { %p1475_p6 = scmp.ne.s32.totalorder %s349_s16, %s1474_s11  ;;  %p1482_p3 = scmp.lt.s32.totalorder %s349_s16, %s349_s16 }
  0x54   : > { %p2272_p2 = pneg %p2271_p13  ;;  %p1483_p8 = scmp.lt.s32.totalorder %s1474_s11, %s1474_s11 }
  0x56   : > { %p1477_p0 = pnand %p1475_p6, %p2272_p2  ;;  %p1484_p9 = por %p1483_p8, %p1482_p3 }
  0x58   : > { %p1478_p7 = pneg %p1477_p0 }
  0x5a   : > { %p1485_p10 = pnand %p1484_p9, %p1478_p7 }
  0x5c   : > { %1488 = shalt.err (!%p1485_p10)
}
  0x5d   : > { %s2273_s17 = smov 4   ;;  %s2274_s8 = smov 64  }
  0x5e   : > { %s2275_s4 = sld [smem:[#allocation30_spill]]  ;;  %s1500_s26 = scalar_lea.vmem %s362_s30, 512 }
  0x5f   : > { %p1501_p1 = scmp.ne.s32.totalorder %s362_s30, %s1500_s26  ;;  %p2276_p5 = pmov %p2272_p2 }
  0x60   : > { %p1508_p2 = scmp.lt.s32.totalorder %s362_s30, %s362_s30  ;;  %p1509_p0 = scmp.lt.s32.totalorder %s1500_s26, %s1500_s26 }
  0x61   : > { %p1503_p12 = pnand %p1501_p1, %p2276_p5 }
  0x62   : > { %p1510_p7 = por %p1509_p0, %p1508_p2 }
  0x63   : > { %p1504_p6 = pneg %p1503_p12 }
  0x64   : > { %1322 = dma.hbm_to_vmem [thread:$0]  (!%p2271_p13), %s2275_s4, 512, %s349_s16, [#allocation9], %s2274_s8, %s2274_s8, %s2273_s17  }
  0x65   : > { %p1511_p3 = pnand %p1510_p7, %p1504_p6 }
  0x67   : > { %1514 = shalt.err (!%p1511_p3)
}
  0x68   : > { %1325 = dma.hbm_to_vmem [thread:$0]  (!%p2271_p13), %s2220_s5, 512, %s362_s30, [#allocation12], %s2274_s8, %s2274_s8, %s2273_s17  }
  0x69   : > { %s1955_s26 = scalar_lea.hbm %s2215_s0, %s1877_s25  ;;  %s388_s15 = scalar_lea.vmem [#allocation2], %s1861_s24 }
  0x6a   : > { %s395_s3 = sshll.u32 %s388_s15, 4  ;;  %s1964_s14 = scalar_lea.hbm %s2217_s2, %s1877_s25  ;;  %s1958_s3 = int_to_ptr.vmem [resolvable:$true] %s395_s3 }
  0x6b   : > { %s2277_s1 = sand.u32 1, %s1699_s19   ;;  %s1515_s30 = scalar_lea.hbm %s1955_s26, 512 }
  0x6c   : > { %s385_s4 = scalar_lea.sflag [#allocation3], %s2277_s1  ;;  %p1516_p13 = scmp.ne.s32.totalorder %s1955_s26, %s1515_s30 }
  0x6d   : > { %s1520_s16 = scalar_lea.hbm %s2215_s0, 1024  ;;  %p1521_p10 = scmp.lt.s32.totalorder %s1955_s26, %s2215_s0 }
  0x6e   : > { %p1518_p8 = pnand %p1516_p13, %p1903_p11  ;;  %p1522_p1 = scmp.lt.s32.totalorder %s1520_s16, %s1515_s30 }
  0x70   : > { %p1519_p9 = pneg %p1518_p8  ;;  %p1523_p5 = por %p1522_p1, %p1521_p10 }
  0x72   : > { %p1524_p12 = pnand %p1523_p5, %p1519_p9 }
  0x74   : > { %1527 = shalt.err (!%p1524_p12)
}
  0x75   : > { %s1528_s1 = scalar_lea.vmem %s1958_s3, 512  ;;  %s1713_s25 = smov [#allocation2]  }
  0x76   : > { %p1529_p6 = scmp.ne.s32.totalorder %s1958_s3, %s1528_s1  ;;  %s1533_s22 = sshll.u32 %s1713_s25, 4  ;;  %s1534_s22 = int_to_ptr.vmem [resolvable:$false] %s1533_s22 }
  0x77   : > { %s1535_s11 = scalar_lea.vmem %s1534_s22, 1024  ;;  %p1536_p7 = scmp.lt.s32.totalorder %s1958_s3, %s1534_s22 }
  0x78   : > { %p1531_p2 = pnand %p1529_p6, %p1903_p11  ;;  %p1537_p3 = scmp.lt.s32.totalorder %s1535_s11, %s1528_s1 }
  0x7a   : > { %p1532_p0 = pneg %p1531_p2  ;;  %p1538_p13 = por %p1537_p3, %p1536_p7 }
  0x7c   : > { %p1539_p8 = pnand %p1538_p13, %p1532_p0 }
  0x7e   : > { %1542 = shalt.err (!%p1539_p8)
}
  0x7f   : > { %s2278_s30 = smov 8   ;;  %s2279_s17 = smov 128  }
  0x80   : > { %1329 = dma.hbm_to_vmem [thread:$0]  (!%p1883_p4), %s1955_s26, 512, %s1958_s3, %s385_s4, %s2279_s17, %s2279_s17, %s2278_s30  }
  0x81   : > { %s430_s8 = scalar_lea.vmem [#allocation7], %s1861_s24  ;;  %s1543_s20 = scalar_lea.hbm %s1964_s14, 512 }
  0x82   : > { %s437_s16 = sshll.u32 %s430_s8, 4  ;;  %p1544_p9 = scmp.ne.s32.totalorder %s1964_s14, %s1543_s20  ;;  %s438_s16 = int_to_ptr.vmem [resolvable:$true] %s437_s16 }
  0x83   : > { %s1548_s25 = scalar_lea.hbm %s2217_s2, 1024  ;;  %p1549_p5 = scmp.lt.s32.totalorder %s1964_s14, %s2217_s2 }
  0x84   : > { %p1546_p10 = pnand %p1544_p9, %p1903_p11  ;;  %p1550_p12 = scmp.lt.s32.totalorder %s1548_s25, %s1543_s20 }
  0x86   : > { %p1547_p1 = pneg %p1546_p10  ;;  %p1551_p6 = por %p1550_p12, %p1549_p5 }
  0x88   : > { %p1552_p2 = pnand %p1551_p6, %p1547_p1 }
  0x8a   : > { %1555 = shalt.err (!%p1552_p2)
}
  0x8b   : > { %s1556_s4 = scalar_lea.vmem %s438_s16, 512  ;;  %s1714_s24 = smov [#allocation7]  }
  0x8c   : > { %p1557_p0 = scmp.ne.s32.totalorder %s438_s16, %s1556_s4  ;;  %s1561_s3 = sshll.u32 %s1714_s24, 4  ;;  %s1562_s3 = int_to_ptr.vmem [resolvable:$false] %s1561_s3 }
  0x8d   : > { %s1563_s26 = scalar_lea.vmem %s1562_s3, 1024  ;;  %p1564_p13 = scmp.lt.s32.totalorder %s438_s16, %s1562_s3 }
  0x8e   : > { %p1559_p7 = pnand %p1557_p0, %p1903_p11  ;;  %p1565_p8 = scmp.lt.s32.totalorder %s1563_s26, %s1556_s4 }
  0x90   : > { %p1560_p3 = pneg %p1559_p7  ;;  %p1566_p9 = por %p1565_p8, %p1564_p13 }
  0x92   : > { %p1567_p10 = pnand %p1566_p9, %p1560_p3 }
  0x94   : > { %1570 = shalt.err (!%p1567_p10)
}
  0x95   : > { %1335 = dma.hbm_to_vmem [thread:$0]  (!%p1883_p4), %s1964_s14, 512, %s438_s16, %s1897_s27, %s2279_s17, %s2279_s17, %s2278_s30  }
  0x96   : > { %p2280_p11 = scmp.ne.s32.totalorder %s2265_s12, 0 }
  0x97   : > { %s2015_s13 = sand.u32 (!%p2280_p11), 1, %s1695_s18   ;;  %p2281_p1 = scmp.ne.s32.totalorder (!%p2280_p11), %s2261_s28, 0 }
  0x98   : > { %449 = sbr.rel (%p2280_p11) target bundleno = 449 (0x1c1), region = 56  ;;  %s2018_s8 = sshll.u32 (!%p2280_p11), %s2015_s13, 5 }
  0x99   : > { %s452_s20 = scalar_lea.sflag (!%p2280_p11), [#allocation3], %s2015_s13  ;;  %s2022_s23 = scalar_lea.vmem (!%p2280_p11), [#allocation2], %s2018_s8 }
  0x9d   : > { %1666 = dma.done.wait (%p2281_p1), %s452_s20, 512  }
  0x9e   : > { %1668 = vsyncadd (%p2281_p1), %s452_s20, 4294966784  ;;  %s460_s12 = sand.u32 1, %s1803_s21   ;;  %s2032_s14 = scalar_lea.vmem [#allocation5], %s2018_s8 }
  0x9f   : > { %s461_s27 = scalar_lea.sflag [#allocation6], %s460_s12 }
  0xa0   : > { %1670 = dma.done.wait (%p2281_p1), %s461_s27, 1024  }
  0xa1   : > { %1672 = vsyncadd (%p2281_p1), %s461_s27, 4294966272  ;;  %s2039_s30 = scalar_lea.vmem [#allocation7], %s2018_s8  ;;  %p2282_p4 = scmp.eq.s32.totalorder %s1803_s21, 0 }
  0xa3   : > { %1674 = dma.done.wait (%p2282_p4), [#allocation9], 1024   ;;  %p2283_p5 = pmov %p2282_p4 }
  0xa4   : > { %p2284_p12 = pmov %p2282_p4 }
  0xa5   : > { %1676 = vsyncadd (%p2283_p5), [#allocation9], 4294966272 }
  0xa6   : > { %1678 = dma.done.wait (%p2284_p12), [#allocation12], 512   ;;  %p2285_p6 = pmov %p2282_p4 }
  0xa7   : > { %v1397_v0 = vld [vmem:[#allocation8 + $0x18] sm:$0xff]   ;;  %v1398_v1 = vld [vmem:[#allocation8 + $0x10] sm:$0xff]   ;;  %v1400_v3 = vld [vmem:[#allocation8 + $0x8] sm:$0xff]   ;;  %vm596_vm0 = vcmask 523264   ;;  %s1181_s16 = sshll.u32 %s2015_s13, 4  ;;  %vm668_vm1 = vcmask 519168  }
  0xa8   : > { %1680 = vsyncadd (%p2285_p6), [#allocation12], 4294966784  ;;  %1256 = vmatprep.subr.bf16.mxu0 %v1397_v0  ;;  %v1399_v2 = vld [vmem:[#allocation10 + $0x18] sm:$0xff]   ;;  %v1401_v4 = vld [vmem:[#allocation10 + $0x10] sm:$0xff]   ;;  %s529_s25 = scalar_lea.vmem [#allocation13], %s1181_s16  ;;  %s1235_s11 = sshll.u32 %s1803_s21, 8 }
  0xa9   : > { %1257 = vmatpush3.bf16.msra.mxu0 %v1397_v0  ;;  %1268 = vmatprep.subr.bf16.mxu1 %v1399_v2  ;;  %v551_v5 = vld [vmem:[%s2022_s23] sm:$0xff]  ;;  %v552_v6 = vld [vmem:[%s2022_s23 + $0x8] sm:$0xff]  ;;  %v553_v10 = vld [vmem:[%s2022_s23 + $0x10] sm:$0xff]  ;;  %s921_s22 = sshll.u32 %s529_s25, 4  ;;  %s2079_s4 = scalar_lea.vmem [#allocation14], %s1181_s16  ;;  %s2076_s22 = int_to_ptr.vmem [resolvable:$true] %s921_s22 }
  0xaa   : > { %1258 = vmatprep.subr.bf16.mxu0 %v1398_v1  ;;  %1269 = vmatpush3.bf16.msra.mxu1 %v1399_v2  ;;  %v555_v7 = vpack.c.bf16 %v552_v6, %v551_v5  ;;  %v1403_v8 = vld [vmem:[#allocation10 + $0x8] sm:$0xff]   ;;  %v1402_v9 = vld [vmem:[#allocation8] sm:$0xff]   ;;  %v554_v12 = vld [vmem:[%s2022_s23 + $0x18] sm:$0xff]  ;;  %s937_s24 = sshll.u32 %s2079_s4, 4  ;;  %s2090_s20 = scalar_lea.hbm %s2224_s9, %s1235_s11  ;;  %s2092_s24 = int_to_ptr.vmem [resolvable:$true] %s937_s24 }
  0xab   : > { %1270 = vmatprep.subr.bf16.mxu1 %v1401_v4  ;;  %v1405_v11 = vld [vmem:[#allocation10] sm:$0xff]   ;;  %v674_v14 = vld [vmem:[%s2032_s14 + $0x8] sm:$0xff]  ;;  %v1404_v15 = vld [vmem:[#allocation11 + $0x18] sm:$0xff]   ;;  %v556_v19 = vpack.c.bf16 %v554_v12, %v553_v10  ;;  %s1571_s28 = scalar_lea.vmem %s2076_s22, 256  ;;  %p2286_p0 = scmp.ne.s32.totalorder %s2262_s29, 0 }
  0xac   : > { %1264 = vmatprep.mubr.msk.bf16.mxu0 %vm596_vm0, %v555_v7  ;;  %v673_v13 = vld [vmem:[%s2032_s14] sm:$0xff]  ;;  %v675_v17 = vld [vmem:[%s2032_s14 + $0x10] sm:$0xff]  ;;  %v676_v18 = vld [vmem:[%s2032_s14 + $0x18] sm:$0xff]  ;;  %s2100_s14 = scalar_lea.hbm %s2225_s10, %s1235_s11  ;;  %p1572_p2 = scmp.ne.s32.totalorder %s2076_s22, %s1571_s28 }
  0xad   : > { %1259 = vmatpush3.bf16.msra.mxu0 %v1398_v1  ;;  %v677_v16 = vpack.c.bf16 %v674_v14, %v673_v13  ;;  %v793_v20 = vld [vmem:[%s2039_s30] sm:$0xff]  ;;  %v794_v21 = vld [vmem:[%s2039_s30 + $0x8] sm:$0xff]  ;;  %v1406_v22 = vld [vmem:[#allocation11 + $0x10] sm:$0xff]   ;;  %v678_v23 = vpack.c.bf16 %v676_v18, %v675_v17  ;;  %s1715_s17 = smov [#allocation13]  }
  0xae   : > { %1260 = vmatprep.subr.bf16.mxu0 %v1400_v3  ;;  %1271 = vmatpush3.bf16.msra.mxu1 %v1401_v4  ;;  %v797_v24 = vpack.c.bf16 %v794_v21, %v793_v20  ;;  %v1407_v25 = vld [vmem:[#allocation11 + $0x8] sm:$0xff]   ;;  %v1408_v26 = vld [vmem:[#allocation11] sm:$0xff]   ;;  %v795_v27 = vld [vmem:[%s2039_s30 + $0x10] sm:$0xff]  ;;  %p1573_p7 = pnand %p1572_p2, %p2286_p0  ;;  %s1575_s16 = sshll.u32 %s1715_s17, 4  ;;  %s1576_s16 = int_to_ptr.vmem [resolvable:$false] %s1575_s16 }
  0xaf   : > { %1272 = vmatprep.subr.bf16.mxu1 %v1403_v8  ;;  %1276 = vmatprep.mubr.msk.bf16.mxu1 %vm596_vm0, %v677_v16  ;;  %v796_v28 = vld [vmem:[%s2039_s30 + $0x18] sm:$0xff]  ;;  %v1184_v30 = vld [vmem:[%s2221_s6] ss:$0 sm:$0xff]  ;;  %s898_s30 = scalar_lea.sflag [#allocation4], %s2015_s13  ;;  %s1577_s15 = scalar_lea.vmem %s1576_s16, 512 }
  0xb0   : > { %v798_v29 = vpack.c.bf16 %v796_v28, %v795_v27  ;;  %v1195_v32 = vld [vmem:[%s2222_s7] ss:$0 sm:$0xff]  ;;  %p1574_p3 = pneg %p1573_p7  ;;  %p1578_p13 = scmp.lt.s32.totalorder %s2076_s22, %s1576_s16 }
  0xb1   : > { %1261 = vmatpush3.bf16.msra.mxu0 %v1400_v3  ;;  %p1579_p8 = scmp.lt.s32.totalorder %s1577_s15, %s1571_s28 }
  0xb2   : > { %1262 = vmatprep.subr.bf16.mxu0 %v1402_v9  ;;  %1273 = vmatpush3.bf16.msra.mxu1 %v1403_v8 }
  0xb3   : > { %1274 = vmatprep.subr.bf16.mxu1 %v1405_v11  ;;  %p1580_p9 = por %p1579_p8, %p1578_p13 }
  0xb5   : > { %1263 = vmatpush3.bf16.msra.mxu0 %v1402_v9  ;;  %p1581_p10 = pnand %p1580_p9, %p1574_p3 }
  0xb6   : > { %1280 = vmatprep.subr.bf16.mxu0 %v1404_v15  ;;  %1275 = vmatpush3.bf16.msra.mxu1 %v1405_v11 }
  0xb8   : > { %1265 = vmatmul.mubr.msk.bf16.vlgmr.msra.gmra.mxu0 %vm596_vm0, %v556_v19 }
  0xb9   : > { %1281 = vmatpush3.bf16.msra.mxu0 %v1404_v15  ;;  %1288 = vmatprep.mubr.msk.bf16.mxu0 %vm596_vm0, %v797_v24 }
  0xba   : > { %1282 = vmatprep.subr.bf16.mxu0 %v1406_v22  ;;  %1277 = vmatmul.mubr.msk.bf16.vlgmr.msra.gmra.mxu1 %vm596_vm0, %v678_v23 }
  0xbd   : > { %1283 = vmatpush3.bf16.msra.mxu0 %v1406_v22 }
  0xbe   : > { %1284 = vmatprep.subr.bf16.mxu0 %v1407_v25 }
  0xc1   : > { %1285 = vmatpush3.bf16.msra.mxu0 %v1407_v25 }
  0xc2   : > { %1286 = vmatprep.subr.bf16.mxu0 %v1408_v26 }
  0xc5   : > { %1287 = vmatpush3.bf16.msra.mxu0 %v1408_v26 }
  0xc8   : > { %1289 = vmatmul.mubr.msk.bf16.vlgmr.msra.gmra.mxu0 %vm596_vm0, %v798_v29 }
 0x178   : > { %v1266_v31 = vpop.f32.mrf.mxu0 }
 0x179   : > { %v646_v33 = vadd.f32 %v1266_v31, %v1184_v30 }
 0x17a   : > { %v637_v34 = vpop.f32.mrf.mxu0  ;;  %v1278_v35 = vpop.f32.mrf.mxu1 }
 0x17b   : > { %v1229_v36 = vpack.c.bf16 %v646_v33, %v646_v33  ;;  %v638_v37 = vadd.f32 %v1184_v30, %v637_v34  ;;  %v767_v38 = vadd.f32 %v1278_v35, %v1195_v32 }
 0x17c   : > { %v1267_v39 = vpop.f32.mrf.mxu0  ;;  %v758_v40 = vpop.f32.mrf.mxu1 }
 0x17d   : > { %671 = vst.msk [vmem:[%s529_s25 + $0x8] sm:$0xf] %vm668_vm1, %v1229_v36  ;;  %v1227_v41 = vpack.c.bf16 %v638_v37, %v638_v37  ;;  %v649_v42 = vadd.f32 %v1267_v39, %v1184_v30  ;;  %v1233_v43 = vpack.c.bf16 %v767_v38, %v767_v38  ;;  %v759_v44 = vadd.f32 %v1195_v32, %v758_v40 }
 0x17e   : > { %v640_v45 = vpop.f32.mrf.mxu0  ;;  %v1279_v46 = vpop.f32.mrf.mxu1 }
 0x17f   : > { %669 = vst.msk [vmem:[%s529_s25] sm:$0xf] %vm668_vm1, %v1227_v41  ;;  %v1230_v47 = vpack.c.bf16 %v649_v42, %v649_v42  ;;  %v641_v48 = vadd.f32 %v1184_v30, %v640_v45  ;;  %791 = vst.msk [vmem:[%s2079_s4 + $0x8] sm:$0xf] %vm668_vm1, %v1233_v43  ;;  %v1231_v49 = vpack.c.bf16 %v759_v44, %v759_v44 }
 0x180   : > { %v770_v50 = vadd.f32 %v1279_v46, %v1195_v32  ;;  %v761_v51 = vpop.f32.mrf.mxu1 }
 0x181   : > { %672 = vst.msk [vmem:[%s529_s25 + $0xc] sm:$0xf] %vm668_vm1, %v1230_v47  ;;  %v1228_v52 = vpack.c.bf16 %v641_v48, %v641_v48  ;;  %789 = vst.msk [vmem:[%s2079_s4] sm:$0xf] %vm668_vm1, %v1231_v49  ;;  %v762_v54 = vadd.f32 %v1195_v32, %v761_v51 }
 0x182   : > { %v1234_v53 = vpack.c.bf16 %v770_v50, %v770_v50 }
 0x183   : > { %670 = vst.msk [vmem:[%s529_s25 + $0x4] sm:$0xf] %vm668_vm1, %v1228_v52  ;;  %v1232_v55 = vpack.c.bf16 %v762_v54, %v762_v54 }
 0x184   : > { %792 = vst.msk [vmem:[%s2079_s4 + $0xc] sm:$0xf] %vm668_vm1, %v1234_v53 }
 0x185   : > { %1584 = shalt.err (!%p1581_p10)
}
 0x186   : > { %s1585_s1 = scalar_lea.hbm %s2090_s20, 256  ;;  %s1589_s3 = scalar_lea.hbm %s2224_s9, 512 }
 0x187   : > { %p1586_p11 = scmp.ne.s32.totalorder %s2090_s20, %s1585_s1  ;;  %p1590_p5 = scmp.lt.s32.totalorder %s2090_s20, %s2224_s9 }
 0x188   : > { %p1591_p12 = scmp.lt.s32.totalorder %s1589_s3, %s1585_s1 }
 0x189   : > { %p1587_p1 = pnand %p1586_p11, %p2286_p0 }
 0x18a   : > { %p1592_p6 = por %p1591_p12, %p1590_p5 }
 0x18b   : > { %p1588_p4 = pneg %p1587_p1 }
 0x18d   : > { %p1593_p2 = pnand %p1592_p6, %p1588_p4 }
 0x18f   : > { %1596 = shalt.err (!%p1593_p2)
}
 0x190   : > { %s1716_s27 = smov 64   ;;  %s1717_s28 = smov 4   ;;  %790 = vst.msk [vmem:[%s2079_s4 + $0x4] sm:$0xf] %vm668_vm1, %v1232_v55 }
 0x191   : > { %1310 = dma.vmem_to_hbm [thread:$0]  (%p2286_p0), %s2076_s22, 256, %s2090_s20, %s898_s30, %s1716_s27, %s1716_s27, %s1717_s28  }
 0x192   : > { %s2287_s15 = sld [smem:[#allocation31_spill]]  ;;  %s2135_s1 = scalar_lea.sflag [#allocation15], %s460_s12 }
 0x193   : > { %s1597_s25 = scalar_lea.vmem %s2092_s24, 256  ;;  %s1718_s11 = smov [#allocation14]  }
 0x194   : > { %p1598_p7 = scmp.ne.s32.totalorder %s2092_s24, %s1597_s25  ;;  %s1601_s3 = sshll.u32 %s1718_s11, 4  ;;  %s1602_s3 = int_to_ptr.vmem [resolvable:$false] %s1601_s3 }
 0x195   : > { %s1603_s26 = scalar_lea.vmem %s1602_s3, 512  ;;  %p1604_p8 = scmp.lt.s32.totalorder %s2092_s24, %s1602_s3 }
 0x196   : > { %p1599_p3 = pnand %p1598_p7, %p2286_p0  ;;  %p1605_p9 = scmp.lt.s32.totalorder %s1603_s26, %s1597_s25 }
 0x198   : > { %v1206_v56 = vld [vmem:[%s2287_s15] ss:$0 sm:$0xff]  ;;  %p1600_p13 = pneg %p1599_p3  ;;  %p1606_p10 = por %p1605_p9, %p1604_p8 }
 0x19a   : > { %p1607_p11 = pnand %p1606_p10, %p1600_p13 }
 0x19c   : > { %1610 = shalt.err (!%p1607_p11)
}
 0x19d   : > { %s1611_s13 = scalar_lea.hbm %s2100_s14, 256  ;;  %s1615_s4 = scalar_lea.hbm %s2225_s10, 512 }
 0x19e   : > { %p1612_p1 = scmp.ne.s32.totalorder %s2100_s14, %s1611_s13  ;;  %p1616_p12 = scmp.lt.s32.totalorder %s2100_s14, %s2225_s10 }
 0x19f   : > { %p1617_p6 = scmp.lt.s32.totalorder %s1615_s4, %s1611_s13 }
 0x1a0   : > { %p1613_p4 = pnand %p1612_p1, %p2286_p0 }
 0x1a1   : > { %p1618_p2 = por %p1617_p6, %p1616_p12 }
 0x1a2   : > { %p1614_p5 = pneg %p1613_p4 }
 0x1a4   : > { %p1619_p7 = pnand %p1618_p2, %p1614_p5 }
 0x1a6   : > { %1622 = shalt.err (!%p1619_p7)
}
 0x1a7   : > { %1311 = dma.vmem_to_hbm [thread:$0]  (%p2286_p0), %s2092_s24, 256, %s2100_s14, %s2135_s1, %s1716_s27, %s1716_s27, %s1717_s28   ;;  %v1290_v57 = vpop.f32.mrf.mxu0 }
 0x1a8   : > { %v887_v58 = vadd.f32 %v1290_v57, %v1206_v56  ;;  %s543_s23 = scalar_lea.vmem [#allocation16], %s2018_s8  ;;  %s1237_s16 = sshll.u32 %s1803_s21, 9 }
 0x1a9   : > { %v878_v59 = vpop.f32.mrf.mxu0  ;;  %s953_s17 = sshll.u32 %s543_s23, 4  ;;  %s2288_s14 = sld [smem:[#allocation32_spill]]  ;;  %s2165_s17 = int_to_ptr.vmem [resolvable:$true] %s953_s17 }
 0x1aa   : > { %895 = vst.msk [vmem:[%s543_s23 + $0x10] sm:$0xff] %vm596_vm0, %v887_v58  ;;  %v879_v60 = vadd.f32 %v1206_v56, %v878_v59  ;;  %s1623_s21 = scalar_lea.vmem %s2165_s17, 512  ;;  %s1719_s28 = smov [#allocation16]  }
 0x1ab   : > { %v1291_v61 = vpop.f32.mrf.mxu0  ;;  %p1624_p3 = scmp.ne.s32.totalorder %s2165_s17, %s1623_s21  ;;  %s1627_s15 = sshll.u32 %s1719_s28, 4  ;;  %s1628_s15 = int_to_ptr.vmem [resolvable:$false] %s1627_s15 }
 0x1ac   : > { %893 = vst.msk [vmem:[%s543_s23] sm:$0xff] %vm596_vm0, %v879_v60  ;;  %v890_v62 = vadd.f32 %v1291_v61, %v1206_v56  ;;  %s1629_s25 = scalar_lea.vmem %s1628_s15, 1024  ;;  %p1630_p9 = scmp.lt.s32.totalorder %s2165_s17, %s1628_s15 }
 0x1ad   : > { %v881_v63 = vpop.f32.mrf.mxu0  ;;  %p1625_p13 = pnand %p1624_p3, %p2286_p0  ;;  %p1631_p10 = scmp.lt.s32.totalorder %s1629_s25, %s1623_s21 }
 0x1ae   : > { %896 = vst.msk [vmem:[%s543_s23 + $0x18] sm:$0xff] %vm596_vm0, %v890_v62  ;;  %v882_v0 = vadd.f32 %v1206_v56, %v881_v63 }
 0x1af   : > { %s2171_s27 = scalar_lea.hbm %s2288_s14, %s1237_s16  ;;  %p1626_p8 = pneg %p1625_p13 }
 0x1b0   : > { %894 = vst.msk [vmem:[%s543_s23 + $0x8] sm:$0xff] %vm596_vm0, %v882_v0  ;;  %p1632_p11 = por %p1631_p10, %p1630_p9 }
 0x1b2   : > { %p1633_p1 = pnand %p1632_p11, %p1626_p8 }
 0x1b4   : > { %1636 = shalt.err (!%p1633_p1)
}
 0x1b5   : > { %s1637_s11 = scalar_lea.hbm %s2171_s27, 512  ;;  %s1641_s13 = scalar_lea.hbm %s2288_s14, 1024 }
 0x1b6   : > { %p1638_p4 = scmp.ne.s32.totalorder %s2171_s27, %s1637_s11  ;;  %p1642_p6 = scmp.lt.s32.totalorder %s2171_s27, %s2288_s14 }
 0x1b7   : > { %p1643_p2 = scmp.lt.s32.totalorder %s1641_s13, %s1637_s11 }
 0x1b8   : > { %p1639_p5 = pnand %p1638_p4, %p2286_p0 }
 0x1b9   : > { %p1644_p7 = por %p1643_p2, %p1642_p6 }
 0x1ba   : > { %p1640_p12 = pneg %p1639_p5 }
 0x1bc   : > { %p1645_p3 = pnand %p1644_p7, %p1640_p12 }
 0x1be   : > { %1648 = shalt.err (!%p1645_p3)
}
 0x1bf   : > { %s1720_s4 = smov 128   ;;  %s1721_s20 = smov 8  }
 0x1c0   : > { %1312 = dma.vmem_to_hbm [thread:$0]  (%p2286_p0), %s2165_s17, 512, %s2171_s27, %s2135_s1, %s1720_s4, %s1720_s4, %s1721_s20  }
 0x1c1 PF: > { %s2289_s30 = sld [smem:[#allocation23_spill]] }
 0x1c2   : > { %s2290_s23 = sld [smem:[#allocation27_spill]] }
 0x1c3   : > { %s2291_s16 = sld [smem:[#allocation24_spill]] }
 0x1c7   : > { %s968_s8 = sand.u32 1, %s2289_s30  }
 0x1c8   : > { %p2292_p13 = scmp.ne.s32.totalorder %s2290_s23, 0  ;;  %s969_s24 = scalar_lea.sflag [#allocation4], %s968_s8 }
 0x1c9   : > { %p2293_p8 = scmp.ge.s32.totalorder %s2291_s16, 2 }
 0x1cb   : > { %p1337_p9 = pnand %p2293_p8, %p2292_p13 }
 0x1cd   : > { %p1338_p10 = pneg %p1337_p9 }
 0x1cf   : > { %1682 = dma.done.wait (%p1338_p10), %s969_s24, 256  }
 0x1d0   : > { %1684 = vsyncadd (%p1338_p10), %s969_s24, 4294967040  ;;  %s2294_s21 = sadd.s32 4294967294, %s2291_s16  }
 0x1d1   : > { %s977_s28 = sand.u32 1, %s2294_s21  }
 0x1d2   : > { %s978_s15 = scalar_lea.sflag [#allocation15], %s977_s28 }
 0x1d3   : > { %1686 = dma.done.wait (%p1338_p10), %s978_s15, 768  }
 0x1d4   : > { %1688 = vsyncadd (%p1338_p10), %s978_s15, 4294966528  ;;  %s2295_s20 = sld [smem:[#allocation25_spill]]  ;;  %s2297_s17 = smov %s1695_s18 }
 0x1d5   : > { %s2296_s29 = sld [smem:[#allocation26_spill]]  ;;  %s2298_s18 = smov %s1699_s19 }
 0x1da   : > { %p33_p0 = scmp.ge.s32.totalorder %s2295_s20, 4  }
 0x1db   : > { %s2299_s19 = smov %s2296_s29 }
 0x1dc   :  { %35 = sbr.rel (!%p33_p0) target bundleno = 17 (0x11), region = 169 }
 0x1e1   :  { %992 = vsyncpa [#allocation3], 1 }
 0x1e2   :  { %994 = vsyncpa [#allocation3 + $0x1], 1 }
 0x1e3   :  { %995 = vsyncpa [#allocation6], 1 }
 0x1e4   :  { %997 = vsyncpa [#allocation6 + $0x1], 1 }
 0x1e5   :  { %998 = vsyncpa [#allocation9], 1 }
 0x1e6   :  { %999 = vsyncpa [#allocation12], 1 }
 0x1e7   :  { %1000 = vsyncpa [#allocation4], 1 }
 0x1e8   :  { %1002 = vsyncpa [#allocation4 + $0x1], 1 }
 0x1e9   :  { %1003 = vsyncpa [#allocation15], 1 }
 0x1ea   :  { %1005 = vsyncpa [#allocation15 + $0x1], 1 }

</bundles_post_ra>
